<compile_context>
chip_gen: v6e
topology: v6e:2x2x1
jax: 0.10.0
libtpu: 0.0.40
codegen_flags: <defaults>
</compile_context>

<pallas_src>
import functools

import jax
import jax.numpy as jnp
from jax.experimental import pallas as pl
from jax.experimental.pallas import tpu as pltpu


_VMEM_LIMIT_BYTES = 32 * 1024 * 1024     # safe on v5e/v6e (128 MiB) and v7x (64 MiB)
_MAX_BLOCK_BYTES = 2 * 1024 * 1024       # per x block; x+y double-buffered ~8 MiB


def _stats_kernel(x_ref, w_ref, b_ref, scale_ref, offset_ref,
                  shift_ref, s1_ref, s2_ref, *, eps, inv_n):
    """Accumulate per-channel (shifted) sum / sum-of-squares across the spatial
    grid axis; on the last step emit scale = w/std and offset = b - mean*scale."""
    s = pl.program_id(1)
    x = x_ref[...]                                   # (N, C_blk, HW_blk) f32

    @pl.when(s == 0)
    def _init():
        # Per-channel shift taken from the first chunk keeps the running
        # sum-of-squares well conditioned (no E[x^2]-mean^2 cancellation).
        chunk = jnp.sum(jnp.sum(x, axis=2, keepdims=True), axis=0, keepdims=True)
        shift_ref[...] = chunk * (1.0 / float(x.shape[0] * x.shape[2]))
        s1_ref[...] = jnp.zeros_like(s1_ref)
        s2_ref[...] = jnp.zeros_like(s2_ref)

    xc = x - shift_ref[...]
    s1_ref[...] += jnp.sum(jnp.sum(xc, axis=2, keepdims=True),
                           axis=0, keepdims=True)
    s2_ref[...] += jnp.sum(jnp.sum(xc * xc, axis=2, keepdims=True),
                           axis=0, keepdims=True)

    @pl.when(s == pl.num_programs(1) - 1)
    def _finalize():
        m1 = s1_ref[...] * inv_n                                 # E[x] - shift
        var = jnp.maximum(s2_ref[...] * inv_n - m1 * m1, 0.0)    # biased variance
        mean = shift_ref[...] + m1
        inv_std = jax.lax.rsqrt(var + eps)
        scale = w_ref[...] * inv_std
        scale_ref[...] = scale
        offset_ref[...] = b_ref[...] - mean * scale


def _norm_kernel(x_ref, scale_ref, offset_ref, y_ref):
    y_ref[...] = x_ref[...] * scale_ref[...] + offset_ref[...]


def _pick_hw_block(hw, n, c_blk, max_bytes=_MAX_BLOCK_BYTES):
    """Largest lane-dense (multiple of 128) divisor of hw within the VMEM budget.
    Falls back to the full spatial extent when hw is not a multiple of 128."""
    if hw % 128 != 0:
        return hw
    cap = max(128, (max_bytes // (4 * n * c_blk)) // 128 * 128)
    best = 128
    for d in range(128, min(hw, cap) + 1, 128):
        if hw % d == 0:
            best = d
    return best


def _complex_batchnorm2d_impl(x, w_r, b_r, w_i, b_i, eps=1e-5):
    N, C, H, W = x.shape
    HW = H * W
    CC = 2 * C

    # Real & imag BatchNorms fused as one BN over 2*C channels.  Reshape is free;
    # real()/imag()/concatenate fuse into a single XLA pass (no transposes).
    xr = jnp.real(x).astype(jnp.float32).reshape(N, C, HW)
    xi = jnp.imag(x).astype(jnp.float32).reshape(N, C, HW)
    x2 = jnp.concatenate([xr, xi], axis=1)                        # (N, 2C, HW)
    w = jnp.concatenate([w_r, w_i]).astype(jnp.float32)
    b = jnp.concatenate([b_r, b_i]).astype(jnp.float32)

    # Channel blocks use full sublane groups (multiples of 8); pad if needed.
    c_blk = 8
    ccp = ((CC + c_blk - 1) // c_blk) * c_blk
    if ccp != CC:
        x2 = jnp.pad(x2, ((0, 0), (0, ccp - CC), (0, 0)))
        w = jnp.pad(w, (0, ccp - CC), constant_values=1.0)
        b = jnp.pad(b, (0, ccp - CC))
    w3 = w.reshape(1, ccp, 1)
    b3 = b.reshape(1, ccp, 1)

    hw_blk = _pick_hw_block(HW, N, c_blk)
    grid = (ccp // c_blk, HW // hw_blk)
    inv_n = 1.0 / float(N * HW)

    x_spec = pl.BlockSpec((N, c_blk, hw_blk), lambda c, s: (0, c, s))
    ch_spec = pl.BlockSpec((1, c_blk, 1), lambda c, s: (0, c, 0))
    stat_shape = jax.ShapeDtypeStruct((1, ccp, 1), jnp.float32)

    # Pass 1: per-channel statistics -> scale/offset (tiny outputs).
    scale, offset = pl.pallas_call(
        functools.partial(_stats_kernel, eps=float(eps), inv_n=inv_n),
        out_shape=(stat_shape, stat_shape),
        grid_spec=pltpu.PrefetchScalarGridSpec(
            num_scalar_prefetch=0,
            grid=grid,
            in_specs=[x_spec, ch_spec, ch_spec],
            out_specs=(ch_spec, ch_spec),
            scratch_shapes=[pltpu.VMEM((1, c_blk, 1), jnp.float32)] * 3,
        ),
        compiler_params=pltpu.CompilerParams(
            dimension_semantics=("parallel", "arbitrary"),
            vmem_limit_bytes=_VMEM_LIMIT_BYTES,
        ),
    )(x2, w3, b3)

    # Pass 2: fully parallel, lane-dense affine normalize.
    y2 = pl.pallas_call(
        _norm_kernel,
        out_shape=jax.ShapeDtypeStruct(x2.shape, jnp.float32),
        grid_spec=pltpu.PrefetchScalarGridSpec(
            num_scalar_prefetch=0,
            grid=grid,
            in_specs=[x_spec, ch_spec, ch_spec],
            out_specs=x_spec,
        ),
        compiler_params=pltpu.CompilerParams(
            dimension_semantics=("parallel", "parallel"),
            vmem_limit_bytes=_VMEM_LIMIT_BYTES,
        ),
    )(x2, scale, offset)

    yr = y2[:, :C, :].reshape(N, C, H, W)
    yi = y2[:, C:CC, :].reshape(N, C, H, W)
    return jax.lax.complex(yr, yi)


complex_batchnorm2d = jax.jit(_complex_batchnorm2d_impl, static_argnames=("eps",))


def _reference(x, w_r, b_r, w_i, b_i, eps=1e-5):
    def bn(xx, w, b):
        mean = jnp.mean(xx, axis=(0, 2, 3), keepdims=True)
        var = jnp.mean((xx - mean) ** 2, axis=(0, 2, 3), keepdims=True)
        return (xx - mean) / jnp.sqrt(var + eps) * w.reshape(1, -1, 1, 1) \
            + b.reshape(1, -1, 1, 1)
    return jax.lax.complex(
        bn(jnp.real(x).astype(jnp.float32), w_r, b_r),
        bn(jnp.imag(x).astype(jnp.float32), w_i, b_i),
    )


if __name__ == "__main__":
    N, C, H, W = 2, 4, 16, 16
    eps = 1e-5

    key = jax.random.PRNGKey(0)
    k_re, k_im, k_wr, k_br, k_wi, k_bi = jax.random.split(key, 6)
    x_re = jax.random.normal(k_re, (N, C, H, W), dtype=jnp.float32)
    # give the imag part a non-zero mean / non-unit std to exercise the numerics
    x_im = 1.0 + 0.5 * jax.random.normal(k_im, (N, C, H, W), dtype=jnp.float32)
    x = jax.lax.complex(x_re, x_im)          # complex64, NCHW

    # nn.BatchNorm2d default affine init is weight=1 / bias=0; perturb slightly
    # (deterministically) so the affine path is exercised too.
    w_r = 1.0 + 0.1 * jax.random.normal(k_wr, (C,), dtype=jnp.float32)
    b_r = 0.1 * jax.random.normal(k_br, (C,), dtype=jnp.float32)
    w_i = 1.0 + 0.1 * jax.random.normal(k_wi, (C,), dtype=jnp.float32)
    b_i = 0.1 * jax.random.normal(k_bi, (C,), dtype=jnp.float32)

    y = complex_batchnorm2d(x, w_r, b_r, w_i, b_i, eps=eps)
    y = jax.block_until_ready(y)

    y_ref = _reference(x, w_r, b_r, w_i, b_i, eps=eps)
    assert y.shape == (N, C, H, W) and y.dtype == jnp.complex64
    assert jnp.allclose(jnp.real(y), jnp.real(y_ref), atol=2e-5, rtol=2e-5)
    assert jnp.allclose(jnp.imag(y), jnp.imag(y_ref), atol=2e-5, rtol=2e-5)

    print("KERNEL_OK")
</pallas_src>

<mosaic_0001>
module attributes {stable_mosaic.version = 11 : i64} {
  func.func @_norm_kernel(%arg0: i32, %arg1: i32, %arg2: memref<2x8x256xf32, #tpu.memory_space<vmem>>, %arg3: memref<1x8x1xf32, #tpu.memory_space<vmem>>, %arg4: memref<1x8x1xf32, #tpu.memory_space<vmem>>, %arg5: memref<2x8x256xf32, #tpu.memory_space<vmem>>) attributes {dimension_semantics = [#tpu.dimension_semantics<parallel>, #tpu.dimension_semantics<parallel>], iteration_bounds = array<i64: 1, 1>, scalar_prefetch = 0 : i64, scratch_operands = 0 : i64, tpu.core_type = #tpu.core_type<tc>, window_params = [{transform_indices = @transform_0, window_bounds = array<i64: 2, 8, 256>}, {transform_indices = @transform_1, window_bounds = array<i64: 1, 8, 1>}, {transform_indices = @transform_2, window_bounds = array<i64: 1, 8, 1>}, {transform_indices = @transform_3, window_bounds = array<i64: 2, 8, 256>}]} {
    %c0 = arith.constant 0 : index
    %c0_0 = arith.constant 0 : index
    %c0_1 = arith.constant 0 : index
    %0 = vector.load %arg2[%c0, %c0_0, %c0_1] : memref<2x8x256xf32, #tpu.memory_space<vmem>>, vector<2x8x256xf32>
    %c0_2 = arith.constant 0 : index
    %c0_3 = arith.constant 0 : index
    %c0_4 = arith.constant 0 : index
    %1 = vector.load %arg3[%c0_2, %c0_3, %c0_4] : memref<1x8x1xf32, #tpu.memory_space<vmem>>, vector<1x8x1xf32>
    %2 = vector.broadcast %1 : vector<1x8x1xf32> to vector<2x8x256xf32>
    %3 = arith.mulf %0, %2 : vector<2x8x256xf32>
    %c0_5 = arith.constant 0 : index
    %c0_6 = arith.constant 0 : index
    %c0_7 = arith.constant 0 : index
    %4 = vector.load %arg4[%c0_5, %c0_6, %c0_7] : memref<1x8x1xf32, #tpu.memory_space<vmem>>, vector<1x8x1xf32>
    %5 = vector.broadcast %4 : vector<1x8x1xf32> to vector<2x8x256xf32>
    %6 = arith.addf %3, %5 : vector<2x8x256xf32>
    %c0_8 = arith.constant 0 : index
    %c0_9 = arith.constant 0 : index
    %c0_10 = arith.constant 0 : index
    %7 = vector.load %arg5[%c0_8, %c0_9, %c0_10] : memref<2x8x256xf32, #tpu.memory_space<vmem>>, vector<2x8x256xf32>
    tpu.vector_store %arg5[%c0_8, %c0_9, %c0_10], %6 {strides = array<i32>} : memref<2x8x256xf32, #tpu.memory_space<vmem>>, vector<2x8x256xf32>,
    return
  }
  func.func @transform_0(%arg0: i32, %arg1: i32) -> (i32, i32, i32) {
    %c0_i32 = arith.constant 0 : i32
    %c0_i32_0 = arith.constant 0 : i32
    return %c0_i32, %arg0, %arg1 : i32, i32, i32
  }
  func.func @transform_1(%arg0: i32, %arg1: i32) -> (i32, i32, i32) {
    %c0_i32 = arith.constant 0 : i32
    %c0_i32_0 = arith.constant 0 : i32
    %c0_i32_1 = arith.constant 0 : i32
    return %c0_i32, %arg0, %c0_i32_0 : i32, i32, i32
  }
  func.func @transform_2(%arg0: i32, %arg1: i32) -> (i32, i32, i32) {
    %c0_i32 = arith.constant 0 : i32
    %c0_i32_0 = arith.constant 0 : i32
    %c0_i32_1 = arith.constant 0 : i32
    return %c0_i32, %arg0, %c0_i32_0 : i32, i32, i32
  }
  func.func @transform_3(%arg0: i32, %arg1: i32) -> (i32, i32, i32) {
    %c0_i32 = arith.constant 0 : i32
    %c0_i32_0 = arith.constant 0 : i32
    return %c0_i32, %arg0, %arg1 : i32, i32, i32
  }
}

module attributes {stable_mosaic.version = 11 : i64} {
  func.func @_stats_kernel(%arg0: i32, %arg1: i32, %arg2: memref<2x8x256xf32, #tpu.memory_space<vmem>>, %arg3: memref<1x8x1xf32, #tpu.memory_space<vmem>>, %arg4: memref<1x8x1xf32, #tpu.memory_space<vmem>>, %arg5: memref<1x8x1xf32, #tpu.memory_space<vmem>>, %arg6: memref<1x8x1xf32, #tpu.memory_space<vmem>>, %arg7: memref<1x8x1xf32, #tpu.memory_space<vmem>>, %arg8: memref<1x8x1xf32, #tpu.memory_space<vmem>>, %arg9: memref<1x8x1xf32, #tpu.memory_space<vmem>>) attributes {dimension_semantics = [#tpu.dimension_semantics<parallel>, #tpu.dimension_semantics<arbitrary>], iteration_bounds = array<i64: 1, 1>, scalar_prefetch = 0 : i64, scratch_operands = 3 : i64, tpu.core_type = #tpu.core_type<tc>, window_params = [{transform_indices = @transform_0, window_bounds = array<i64: 2, 8, 256>}, {transform_indices = @transform_1, window_bounds = array<i64: 1, 8, 1>}, {transform_indices = @transform_2, window_bounds = array<i64: 1, 8, 1>}, {transform_indices = @transform_3, window_bounds = array<i64: 1, 8, 1>}, {transform_indices = @transform_4, window_bounds = array<i64: 1, 8, 1>}]} {
    %c0 = arith.constant 0 : index
    %c0_0 = arith.constant 0 : index
    %c0_1 = arith.constant 0 : index
    %0 = vector.load %arg2[%c0, %c0_0, %c0_1] : memref<2x8x256xf32, #tpu.memory_space<vmem>>, vector<2x8x256xf32>
    %c0_i32 = arith.constant 0 : i32
    %1 = arith.cmpi eq, %arg1, %c0_i32 : i32
    %2 = arith.extui %1 : i1 to i32
    %c0_i32_2 = arith.constant 0 : i32
    %3 = arith.cmpi ne, %2, %c0_i32_2 : i32
    scf.if %3 {
      %cst_23 = arith.constant dense<0.000000e+00> : vector<2x8xf32>
      %25 = vector.multi_reduction <add>, %0, %cst_23 [2] : vector<2x8x256xf32> to vector<2x8xf32>
      %26 = vector.shape_cast %25 : vector<2x8xf32> to vector<2x8x1xf32>
      %cst_24 = arith.constant dense<0.000000e+00> : vector<8x1xf32>
      %27 = vector.multi_reduction <add>, %26, %cst_24 [0] : vector<2x8x1xf32> to vector<8x1xf32>
      %28 = vector.shape_cast %27 : vector<8x1xf32> to vector<1x8x1xf32>
      %cst_25 = arith.constant 0.001953125 : f32
      %29 = vector.broadcast %cst_25 : f32 to vector<1x8x1xf32>
      %30 = arith.mulf %28, %29 : vector<1x8x1xf32>
      %c0_26 = arith.constant 0 : index
      %c0_27 = arith.constant 0 : index
      %c0_28 = arith.constant 0 : index
      %31 = vector.load %arg7[%c0_26, %c0_27, %c0_28] : memref<1x8x1xf32, #tpu.memory_space<vmem>>, vector<1x8x1xf32>
      tpu.vector_store %arg7[%c0_26, %c0_27, %c0_28], %30 {strides = array<i32>} : memref<1x8x1xf32, #tpu.memory_space<vmem>>, vector<1x8x1xf32>,
      %cst_29 = arith.constant 0.000000e+00 : f32
      %32 = vector.broadcast %cst_29 : f32 to vector<1x8x1xf32>
      %c0_30 = arith.constant 0 : index
      %c0_31 = arith.constant 0 : index
      %c0_32 = arith.constant 0 : index
      %33 = vector.load %arg8[%c0_30, %c0_31, %c0_32] : memref<1x8x1xf32, #tpu.memory_space<vmem>>, vector<1x8x1xf32>
      tpu.vector_store %arg8[%c0_30, %c0_31, %c0_32], %32 {strides = array<i32>} : memref<1x8x1xf32, #tpu.memory_space<vmem>>, vector<1x8x1xf32>,
      %cst_33 = arith.constant 0.000000e+00 : f32
      %34 = vector.broadcast %cst_33 : f32 to vector<1x8x1xf32>
      %c0_34 = arith.constant 0 : index
      %c0_35 = arith.constant 0 : index
      %c0_36 = arith.constant 0 : index
      %35 = vector.load %arg9[%c0_34, %c0_35, %c0_36] : memref<1x8x1xf32, #tpu.memory_space<vmem>>, vector<1x8x1xf32>
      tpu.vector_store %arg9[%c0_34, %c0_35, %c0_36], %34 {strides = array<i32>} : memref<1x8x1xf32, #tpu.memory_space<vmem>>, vector<1x8x1xf32>,
    } else {
    }
    %c0_3 = arith.constant 0 : index
    %c0_4 = arith.constant 0 : index
    %c0_5 = arith.constant 0 : index
    %4 = vector.load %arg7[%c0_3, %c0_4, %c0_5] : memref<1x8x1xf32, #tpu.memory_space<vmem>>, vector<1x8x1xf32>
    %5 = vector.broadcast %4 : vector<1x8x1xf32> to vector<2x8x256xf32>
    %6 = arith.subf %0, %5 : vector<2x8x256xf32>
    %c0_6 = arith.constant 0 : index
    %c0_7 = arith.constant 0 : index
    %c0_8 = arith.constant 0 : index
    %7 = vector.load %arg8[%c0_6, %c0_7, %c0_8] : memref<1x8x1xf32, #tpu.memory_space<vmem>>, vector<1x8x1xf32>
    %cst = arith.constant dense<0.000000e+00> : vector<2x8xf32>
    %8 = vector.multi_reduction <add>, %6, %cst [2] : vector<2x8x256xf32> to vector<2x8xf32>
    %9 = vector.shape_cast %8 : vector<2x8xf32> to vector<2x8x1xf32>
    %cst_9 = arith.constant dense<0.000000e+00> : vector<8x1xf32>
    %10 = vector.multi_reduction <add>, %9, %cst_9 [0] : vector<2x8x1xf32> to vector<8x1xf32>
    %11 = vector.shape_cast %10 : vector<8x1xf32> to vector<1x8x1xf32>
    %12 = arith.addf %7, %11 : vector<1x8x1xf32>
    %c0_10 = arith.constant 0 : index
    %c0_11 = arith.constant 0 : index
    %c0_12 = arith.constant 0 : index
    %13 = vector.load %arg8[%c0_10, %c0_11, %c0_12] : memref<1x8x1xf32, #tpu.memory_space<vmem>>, vector<1x8x1xf32>
    tpu.vector_store %arg8[%c0_10, %c0_11, %c0_12], %12 {strides = array<i32>} : memref<1x8x1xf32, #tpu.memory_space<vmem>>, vector<1x8x1xf32>,
    %c0_13 = arith.constant 0 : index
    %c0_14 = arith.constant 0 : index
    %c0_15 = arith.constant 0 : index
    %14 = vector.load %arg9[%c0_13, %c0_14, %c0_15] : memref<1x8x1xf32, #tpu.memory_space<vmem>>, vector<1x8x1xf32>
    %15 = arith.mulf %6, %6 : vector<2x8x256xf32>
    %cst_16 = arith.constant dense<0.000000e+00> : vector<2x8xf32>
    %16 = vector.multi_reduction <add>, %15, %cst_16 [2] : vector<2x8x256xf32> to vector<2x8xf32>
    %17 = vector.shape_cast %16 : vector<2x8xf32> to vector<2x8x1xf32>
    %cst_17 = arith.constant dense<0.000000e+00> : vector<8x1xf32>
    %18 = vector.multi_reduction <add>, %17, %cst_17 [0] : vector<2x8x1xf32> to vector<8x1xf32>
    %19 = vector.shape_cast %18 : vector<8x1xf32> to vector<1x8x1xf32>
    %20 = arith.addf %14, %19 : vector<1x8x1xf32>
    %c0_18 = arith.constant 0 : index
    %c0_19 = arith.constant 0 : index
    %c0_20 = arith.constant 0 : index
    %21 = vector.load %arg9[%c0_18, %c0_19, %c0_20] : memref<1x8x1xf32, #tpu.memory_space<vmem>>, vector<1x8x1xf32>
    tpu.vector_store %arg9[%c0_18, %c0_19, %c0_20], %20 {strides = array<i32>} : memref<1x8x1xf32, #tpu.memory_space<vmem>>, vector<1x8x1xf32>,
    %c0_i32_21 = arith.constant 0 : i32
    %22 = arith.cmpi eq, %arg1, %c0_i32_21 : i32
    %23 = arith.extui %22 : i1 to i32
    %c0_i32_22 = arith.constant 0 : i32
    %24 = arith.cmpi ne, %23, %c0_i32_22 : i32
    scf.if %24 {
      %c0_23 = arith.constant 0 : index
      %c0_24 = arith.constant 0 : index
      %c0_25 = arith.constant 0 : index
      %25 = vector.load %arg8[%c0_23, %c0_24, %c0_25] : memref<1x8x1xf32, #tpu.memory_space<vmem>>, vector<1x8x1xf32>
      %cst_26 = arith.constant 0.001953125 : f32
      %26 = vector.broadcast %cst_26 : f32 to vector<1x8x1xf32>
      %27 = arith.mulf %25, %26 : vector<1x8x1xf32>
      %c0_27 = arith.constant 0 : index
      %c0_28 = arith.constant 0 : index
      %c0_29 = arith.constant 0 : index
      %28 = vector.load %arg9[%c0_27, %c0_28, %c0_29] : memref<1x8x1xf32, #tpu.memory_space<vmem>>, vector<1x8x1xf32>
      %cst_30 = arith.constant 0.001953125 : f32
      %29 = vector.broadcast %cst_30 : f32 to vector<1x8x1xf32>
      %30 = arith.mulf %28, %29 : vector<1x8x1xf32>
      %31 = arith.mulf %27, %27 : vector<1x8x1xf32>
      %32 = arith.subf %30, %31 : vector<1x8x1xf32>
      %cst_31 = arith.constant 0.000000e+00 : f32
      %33 = vector.broadcast %cst_31 : f32 to vector<1x8x1xf32>
      %34 = arith.maximumf %32, %33 : vector<1x8x1xf32>
      %c0_32 = arith.constant 0 : index
      %c0_33 = arith.constant 0 : index
      %c0_34 = arith.constant 0 : index
      %35 = vector.load %arg7[%c0_32, %c0_33, %c0_34] : memref<1x8x1xf32, #tpu.memory_space<vmem>>, vector<1x8x1xf32>
      %36 = arith.addf %35, %27 : vector<1x8x1xf32>
      %cst_35 = arith.constant 9.99999974E-6 : f32
      %37 = vector.broadcast %cst_35 : f32 to vector<1x8x1xf32>
      %38 = arith.addf %34, %37 : vector<1x8x1xf32>
      %39 = math.rsqrt %38 : vector<1x8x1xf32>
      %c0_36 = arith.constant 0 : index
      %c0_37 = arith.constant 0 : index
      %c0_38 = arith.constant 0 : index
      %40 = vector.load %arg3[%c0_36, %c0_37, %c0_38] : memref<1x8x1xf32, #tpu.memory_space<vmem>>, vector<1x8x1xf32>
      %41 = arith.mulf %40, %39 : vector<1x8x1xf32>
      %c0_39 = arith.constant 0 : index
      %c0_40 = arith.constant 0 : index
      %c0_41 = arith.constant 0 : index
      %42 = vector.load %arg5[%c0_39, %c0_40, %c0_41] : memref<1x8x1xf32, #tpu.memory_space<vmem>>, vector<1x8x1xf32>
      tpu.vector_store %arg5[%c0_39, %c0_40, %c0_41], %41 {strides = array<i32>} : memref<1x8x1xf32, #tpu.memory_space<vmem>>, vector<1x8x1xf32>,
      %c0_42 = arith.constant 0 : index
      %c0_43 = arith.constant 0 : index
      %c0_44 = arith.constant 0 : index
      %43 = vector.load %arg4[%c0_42, %c0_43, %c0_44] : memref<1x8x1xf32, #tpu.memory_space<vmem>>, vector<1x8x1xf32>
      %44 = arith.mulf %36, %41 : vector<1x8x1xf32>
      %45 = arith.subf %43, %44 : vector<1x8x1xf32>
      %c0_45 = arith.constant 0 : index
      %c0_46 = arith.constant 0 : index
      %c0_47 = arith.constant 0 : index
      %46 = vector.load %arg6[%c0_45, %c0_46, %c0_47] : memref<1x8x1xf32, #tpu.memory_space<vmem>>, vector<1x8x1xf32>
      tpu.vector_store %arg6[%c0_45, %c0_46, %c0_47], %45 {strides = array<i32>} : memref<1x8x1xf32, #tpu.memory_space<vmem>>, vector<1x8x1xf32>,
    } else {
    }
    return
  }
  func.func @transform_0(%arg0: i32, %arg1: i32) -> (i32, i32, i32) {
    %c0_i32 = arith.constant 0 : i32
    %c0_i32_0 = arith.constant 0 : i32
    return %c0_i32, %arg0, %arg1 : i32, i32, i32
  }
  func.func @transform_1(%arg0: i32, %arg1: i32) -> (i32, i32, i32) {
    %c0_i32 = arith.constant 0 : i32
    %c0_i32_0 = arith.constant 0 : i32
    %c0_i32_1 = arith.constant 0 : i32
    return %c0_i32, %arg0, %c0_i32_0 : i32, i32, i32
  }
  func.func @transform_2(%arg0: i32, %arg1: i32) -> (i32, i32, i32) {
    %c0_i32 = arith.constant 0 : i32
    %c0_i32_0 = arith.constant 0 : i32
    %c0_i32_1 = arith.constant 0 : i32
    return %c0_i32, %arg0, %c0_i32_0 : i32, i32, i32
  }
  func.func @transform_3(%arg0: i32, %arg1: i32) -> (i32, i32, i32) {
    %c0_i32 = arith.constant 0 : i32
    %c0_i32_0 = arith.constant 0 : i32
    %c0_i32_1 = arith.constant 0 : i32
    return %c0_i32, %arg0, %c0_i32_0 : i32, i32, i32
  }
  func.func @transform_4(%arg0: i32, %arg1: i32) -> (i32, i32, i32) {
    %c0_i32 = arith.constant 0 : i32
    %c0_i32_0 = arith.constant 0 : i32
    %c0_i32_1 = arith.constant 0 : i32
    return %c0_i32, %arg0, %c0_i32_0 : i32, i32, i32
  }
}

</mosaic_0001>

<bundles_post_ra>
// kernel: custom-call.1
= control target key start
LH: loop header
LB: loop body
LE: loop exit
PB: predicated region body
PF: predicated region fallthrough
CT: control target
= control target key end

     0   :  { %s51_s0 = inlined_call_operand.hbm [shape: c64[2,4,16,16], index: 0, kind: input, shape index: {}]   ;;  %s52_s1 = inlined_call_operand.vmem [shape: f32[2,4,16,16], index: 1, kind: output, shape index: {}]  }
   0x1   :  { %s2_s8 = scalar_lea.hbm %s51_s0, 2048 }
   0x2   :  { %3 = vsyncpa [#allocation0], 0  ;;  %s4_s11 = sshll.u32 %s52_s1, 4  ;;  %s5_s11 = int_to_ptr.vmem [resolvable:$true] %s4_s11 }
   0x3   :  { %s20_s12 = scalar_lea.vmem %s5_s11, 2048  ;;  %p25_p1 = scmp.lt.s32.totalorder %s5_s11, %s5_s11 }
   0x4   :  { %p21_p0 = scmp.ne.s32.totalorder %s5_s11, %s20_s12  ;;  %p26_p2 = scmp.lt.s32.totalorder %s20_s12, %s20_s12 }
   0x6   :  { %p27_p3 = por %p26_p2, %p25_p1 }
   0x8   :  { %p28_p4 = pnand %p27_p3, %p21_p0 }
   0xa   :  { %31 = shalt.err (!%p28_p4)  }
   0xb   :  { %7 = dma.hbm_to_vmem [thread:$0]  %s2_s8, 2048, %s5_s11, [#allocation0] }
   0xc   :  { %33 = dma.done.wait [#allocation0], 2048  }
   0xd   :  { %34 = vsyncadd [#allocation0], 4294965248 }
   0xe   :  { %9 = vsyncpa [#allocation0], 1 }

// kernel: custom-call
= control target key start
LH: loop header
LB: loop body
LE: loop exit
PB: predicated region body
PF: predicated region fallthrough
CT: control target
= control target key end

     0   :  { %2 = vsyncpa [#allocation0], 0  ;;  %s47_s0 = inlined_call_operand.hbm [shape: c64[2,4,16,16], index: 0, kind: input, shape index: {}]   ;;  %s48_s1 = inlined_call_operand.vmem [shape: f32[2,4,16,16], index: 1, kind: output, shape index: {}]  }
   0x1   :  { %s3_s8 = sshll.u32 %s48_s1, 4  ;;  %s4_s8 = int_to_ptr.vmem [resolvable:$true] %s3_s8 }
   0x2   :  { %s17_s9 = scalar_lea.vmem %s4_s8, 2048  ;;  %p22_p1 = scmp.lt.s32.totalorder %s4_s8, %s4_s8 }
   0x3   :  { %p18_p0 = scmp.ne.s32.totalorder %s4_s8, %s17_s9  ;;  %p23_p2 = scmp.lt.s32.totalorder %s17_s9, %s17_s9 }
   0x5   :  { %p24_p3 = por %p23_p2, %p22_p1 }
   0x7   :  { %p25_p4 = pnand %p24_p3, %p18_p0 }
   0x9   :  { %28 = shalt.err (!%p25_p4)  }
   0xa   :  { %6 = dma.hbm_to_vmem [thread:$0]  %s47_s0, 2048, %s4_s8, [#allocation0] }
   0xb   :  { %29 = dma.done.wait [#allocation0], 2048  }
   0xc   :  { %30 = vsyncadd [#allocation0], 4294965248 }
   0xd   :  { %8 = vsyncpa [#allocation0], 1 }

// kernel: custom-call.2
= control target key start
LH: loop header
LB: loop body
LE: loop exit
PB: predicated region body
PF: predicated region fallthrough
CT: control target
= control target key end

     0   :  { %s92_s0 = inlined_call_operand.vmem [shape: f32[2,4,16,16], index: 0, kind: input, shape index: {}]   ;;  %s93_s1 = inlined_call_operand.vmem [shape: f32[2,4,16,16], index: 1, kind: input, shape index: {}]   ;;  %s94_s2 = inlined_call_operand.hbm [shape: c64[2,4,16,16], index: 2, kind: output, shape index: {}]  }
   0x1   :  { %s3_s11 = scalar_lea.hbm %s94_s2, 2048 }
   0x2   :  { %4 = vsyncpa [#allocation0], 0  ;;  %s5_s14 = sshll.u32 %s92_s0, 4  ;;  %s6_s14 = int_to_ptr.vmem [resolvable:$true] %s5_s14 }
   0x3   :  { %s18_s15 = scalar_lea.vmem %s6_s14, 2048  ;;  %p23_p1 = scmp.lt.s32.totalorder %s6_s14, %s6_s14 }
   0x4   :  { %p19_p0 = scmp.ne.s32.totalorder %s6_s14, %s18_s15  ;;  %p24_p2 = scmp.lt.s32.totalorder %s18_s15, %s18_s15 }
   0x6   :  { %p25_p3 = por %p24_p2, %p23_p1 }
   0x8   :  { %p26_p4 = pnand %p25_p3, %p19_p0 }
   0xa   :  { %29 = shalt.err (!%p26_p4)  }
   0xb   :  { %8 = dma.vmem_to_hbm [thread:$0]  %s6_s14, 2048, %s94_s2, [#allocation0] }
   0xc   :  { %61 = dma.done.wait [#allocation0], 2048  }
   0xd   :  { %62 = vsyncadd [#allocation0], 4294965248 }
   0xe   :  { %10 = vsyncpa [#allocation0], 1 }
   0xf   :  { %11 = vsyncpa [#allocation1], 0  ;;  %s12_s0 = sshll.u32 %s93_s1, 4  ;;  %s13_s0 = int_to_ptr.vmem [resolvable:$true] %s12_s0 }
  0x10   :  { %s38_s20 = scalar_lea.vmem %s13_s0, 2048  ;;  %p43_p6 = scmp.lt.s32.totalorder %s13_s0, %s13_s0 }
  0x11   :  { %p39_p5 = scmp.ne.s32.totalorder %s13_s0, %s38_s20  ;;  %p44_p7 = scmp.lt.s32.totalorder %s38_s20, %s38_s20 }
  0x13   :  { %p45_p8 = por %p44_p7, %p43_p6 }
  0x15   :  { %p46_p9 = pnand %p45_p8, %p39_p5 }
  0x17   :  { %49 = shalt.err (!%p46_p9)  }
  0x18   :  { %15 = dma.vmem_to_hbm [thread:$0]  %s13_s0, 2048, %s3_s11, [#allocation1] }
  0x19   :  { %63 = dma.done.wait [#allocation1], 2048  }
  0x1a   :  { %64 = vsyncadd [#allocation1], 4294965248 }
  0x1b   :  { %17 = vsyncpa [#allocation1], 1 }

// kernel: _complex_batchnorm2d_impl.3
= control target key start
LH: loop header
LB: loop body
LE: loop exit
PB: predicated region body
PF: predicated region fallthrough
CT: control target
= control target key end

     0   :  { %v48_v0 = vmov 0   ;;  %s99_s1 = inlined_call_operand.vmem [shape: f32[1,8,1], index: 1, kind: input, shape index: {}]   ;;  %s100_s2 = inlined_call_operand.vmem [shape: f32[1,8,1], index: 2, kind: input, shape index: {}]   ;;  %s101_s0 = inlined_call_operand.vmem [shape: f32[2,8,256], index: 0, kind: input, shape index: {}]   ;;  %s102_s3 = inlined_call_operand.vmem [shape: f32[2,8,256], index: 3, kind: output, shape index: {}]  }
   0x1   :  { %47 = vset.pattern.permute.xlu0 %v48_v0  ;;  %v18_v1 = vld [vmem:[%s99_s1] sm:$0xff]  ;;  %v15_v5 = vld [vmem:[%s101_s0 + $0x8] sm:$0xff]  ;;  %v16_v6 = vld [vmem:[%s101_s0 + $0x10] sm:$0xff] }
   0x2   :  { %21 = vperm.xlu0 %47, %v18_v1   ;;  %v28_v2 = vld [vmem:[%s100_s2] sm:$0xff]  ;;  %v17_v7 = vld [vmem:[%s101_s0 + $0x18] sm:$0xff] }
   0x3   :  { %v14_v3 = vld [vmem:[%s101_s0] sm:$0xff] }
   0x6   :  { %31 = vperm.xlu0 %47, %v28_v2  }
  0x7d   :  { %v22_v4 = vpop.permute.xlu0 %21 }
  0x7e   :  { %v24_v8 = vmul.f32 %v22_v4, %v14_v3  ;;  %v25_v9 = vmul.f32 %v22_v4, %v15_v5  ;;  %v26_v10 = vmul.f32 %v22_v4, %v16_v6  ;;  %v27_v11 = vmul.f32 %v22_v4, %v17_v7 }
  0x81   :  { %v32_v12 = vpop.permute.xlu0 %31 }
  0x82   :  { %v34_v13 = vadd.f32 %v32_v12, %v24_v8  ;;  %v35_v14 = vadd.f32 %v32_v12, %v25_v9  ;;  %v36_v15 = vadd.f32 %v32_v12, %v26_v10  ;;  %v37_v16 = vadd.f32 %v32_v12, %v27_v11 }
  0x84   :  { %38 = vst [vmem:[%s102_s3] sm:$0xff] %v34_v13  ;;  %39 = vst [vmem:[%s102_s3 + $0x8] sm:$0xff] %v35_v14 }
  0x85   :  { %40 = vst [vmem:[%s102_s3 + $0x10] sm:$0xff] %v36_v15  ;;  %41 = vst [vmem:[%s102_s3 + $0x18] sm:$0xff] %v37_v16 }

// kernel: _complex_batchnorm2d_impl.2
= control target key start
LH: loop header
LB: loop body
LE: loop exit
PB: predicated region body
PF: predicated region fallthrough
CT: control target
= control target key end

     0   :  { %v106_v6 = vmov 0   ;;  %vm32_vm0 = vcmask 7168   ;;  %v107_v24 = vmov 0.0   ;;  %s164_s0 = inlined_call_operand.vmem [shape: f32[2,8,256], index: 0, kind: input, shape index: {}]   ;;  %s165_s1 = inlined_call_operand.vmem [shape: f32[1,8,1], index: 1, kind: input, shape index: {}]   ;;  %s166_s2 = inlined_call_operand.vmem [shape: f32[1,8,1], index: 2, kind: input, shape index: {}]   ;;  %s167_s3 = inlined_call_operand.vmem [shape: f32[1,8,1], index: 3, kind: output, shape index: {0}]   ;;  %s168_s4 = inlined_call_operand.vmem [shape: f32[1,8,1], index: 4, kind: output, shape index: {1}]  }
   0x1   :  { %v16_v0 = vld [vmem:[%s164_s0] sm:$0xff]  ;;  %v17_v1 = vld [vmem:[%s164_s0 + $0x8] sm:$0xff]  ;;  %v18_v2 = vld [vmem:[%s164_s0 + $0x10] sm:$0xff]  ;;  %102 = vset.pattern.permute.xlu1 %v106_v6  ;;  %103 = vset.pattern.permute.xlu0 %v106_v6  ;;  %34 = vst.msk [vmem:[#allocation3] sm:$0xff] %vm32_vm0, %v107_v24 }
   0x2   :  { %v24_v3 = vadd.f32 %v17_v1, %v16_v0  ;;  %v19_v4 = vld [vmem:[%s164_s0 + $0x18] sm:$0xff]  ;;  %35 = vst.msk [vmem:[#allocation4] sm:$0xff] %vm32_vm0, %v107_v24  ;;  %v85_v44 = vld [vmem:[%s165_s1] sm:$0xff] }
   0x3   :  { %v27_v5 = vadd.f32 %v19_v4, %v18_v2  ;;  %v88_v48 = vld [vmem:[%s166_s2] sm:$0xff] }
   0x4   :  { %25 = vadd.xlane.f32.xlu0 %v24_v3 }
   0x8   :  { %28 = vadd.xlane.f32.xlu0 %v27_v5  ;;  %v46_v27 = vld [vmem:[#allocation3] sm:$0xff] }
   0x9   :  { %v57_v32 = vld [vmem:[#allocation4] sm:$0xff] }
  0x8d   :  { %v26_v7 = vpop.xlane.xlu0 %25 }
  0x91   :  { %v29_v8 = vpop.xlane.xlu0 %28 }
  0x92   :  { %v30_v9 = vadd.f32 %v29_v8, %v26_v7 }
  0x94   :  { %v31_v10 = vmul.f32 0.001953125, %v30_v9 }
  0x96   :  { %33 = vst.msk [vmem:[#allocation2] sm:$0xff] %vm32_vm0, %v31_v10 }
  0x9d   :  { %v81_v11 = vld [vmem:[#allocation2] sm:$0xff] }
  0x9e   :  { %39 = vperm.xlu1 %102, %v81_v11  }
 0x119   :  { %v40_v12 = vpop.permute.xlu1 %39 }
 0x11a   :  { %v44_v13 = vsub.f32 %v18_v2, %v40_v12  ;;  %v45_v14 = vsub.f32 %v19_v4, %v40_v12  ;;  %v42_v15 = vsub.f32 %v16_v0, %v40_v12  ;;  %v43_v16 = vsub.f32 %v17_v1, %v40_v12 }
 0x11c   :  { %v50_v17 = vadd.f32 %v45_v14, %v44_v13  ;;  %v47_v18 = vadd.f32 %v43_v16, %v42_v15  ;;  %v58_v19 = vmul.f32 %v42_v15, %v42_v15  ;;  %v59_v20 = vmul.f32 %v43_v16, %v43_v16 }
 0x11d   :  { %v60_v22 = vmul.f32 %v44_v13, %v44_v13  ;;  %v61_v23 = vmul.f32 %v45_v14, %v45_v14 }
 0x11e   :  { %51 = vadd.xlane.f32.xlu0 %v50_v17  ;;  %48 = vadd.xlane.f32.xlu1 %v47_v18  ;;  %v62_v21 = vadd.f32 %v59_v20, %v58_v19 }
 0x11f   :  { %v65_v25 = vadd.f32 %v61_v23, %v60_v22 }
 0x122   :  { %63 = vadd.xlane.f32.xlu0 %v62_v21 }
 0x126   :  { %66 = vadd.xlane.f32.xlu0 %v65_v25 }
 0x1a7   :  { %v52_v26 = vpop.xlane.xlu0 %51  ;;  %v49_v28 = vpop.xlane.xlu1 %48 }
 0x1a8   :  { %v53_v29 = vadd.f32 %v52_v26, %v49_v28 }
 0x1aa   :  { %v54_v30 = vadd.f32 %v53_v29, %v46_v27 }
 0x1ab   :  { %v64_v31 = vpop.xlane.xlu0 %63 }
 0x1ac   :  { %56 = vst.msk [vmem:[#allocation3] sm:$0xff] %vm32_vm0, %v54_v30 }
 0x1af   :  { %v67_v33 = vpop.xlane.xlu0 %66 }
 0x1b0   :  { %v68_v34 = vadd.f32 %v67_v33, %v64_v31 }
 0x1b2   :  { %v69_v35 = vadd.f32 %v68_v34, %v57_v32 }
 0x1b3   :  { %v74_v36 = vld [vmem:[#allocation3] sm:$0xff] }
 0x1b4   :  { %70 = vst.msk [vmem:[#allocation4] sm:$0xff] %vm32_vm0, %v69_v35  ;;  %v75_v37 = vmul.f32 0.001953125, %v74_v36 }
 0x1b6   :  { %v78_v39 = vmul.f32 %v75_v37, %v75_v37  ;;  %v82_v46 = vadd.f32 %v81_v11, %v75_v37 }
 0x1bb   :  { %v76_v38 = vld [vmem:[#allocation4] sm:$0xff] }
 0x1bc   :  { %v77_v40 = vmul.f32 0.001953125, %v76_v38 }
 0x1be   :  { %v79_v41 = vsub.f32 %v77_v40, %v78_v39 }
 0x1c0   :  { %v80_v42 = vmax.f32 %v79_v41, 0.0 }
 0x1c2   :  { %v83_v43 = vadd.f32 1e-05, %v80_v42 }
 0x1c4   :  { %104 = vrsqrt.f32 %v83_v43 }
 0x1d1   :  { %v105_v45 = vpop.eup %104 }
 0x1d2   :  { %v86_v47 = vmul.f32 %v105_v45, %v85_v44 }
 0x1d4   :  { %87 = vst.msk [vmem:[%s167_s3] sm:$0xff] %vm32_vm0, %v86_v47  ;;  %v89_v49 = vmul.f32 %v86_v47, %v82_v46 }
 0x1d6   :  { %v90_v50 = vsub.f32 %v88_v48, %v89_v49 }
 0x1d8   :  { %91 = vst.msk [vmem:[%s168_s4] sm:$0xff] %vm32_vm0, %v90_v50 }

</bundles_post_ra>
